<compile_context>
chip_gen: v6e
topology: v6e:2x2x1
jax: 0.10.0
libtpu: 0.0.40
codegen_flags: <defaults>
</compile_context>

<pallas_src>
import functools

import jax
import jax.numpy as jnp
from jax.experimental import pallas as pl
from jax.experimental.pallas import tpu as pltpu


def _channel_attention_kernel(x_ref, w1t_ref, w2_ref, o_ref,
                              sum_ref, max_ref, *, inv_hw):
    # x_ref   : VMEM (1, C, chunk)  lane-dense input slab
    # w1t_ref : VMEM (C, hidden)    fc1 weight (transposed)
    # w2_ref  : VMEM (C, hidden)    fc2 weight
    # o_ref   : VMEM (1, C, 1)      sigmoid attention output block
    # sum_ref : VMEM (C, 1) f32     running spatial sum   (scratch)
    # max_ref : VMEM (C, 1) f32     running spatial max   (scratch)
    s = pl.program_id(1)

    x = x_ref[0].astype(jnp.float32)                   # (C, chunk)
    part_sum = jnp.sum(x, axis=1, keepdims=True)       # (C, 1)
    part_max = jnp.max(x, axis=1, keepdims=True)       # (C, 1)

    @pl.when(s == 0)
    def _init():
        sum_ref[...] = jnp.zeros_like(sum_ref)
        max_ref[...] = jnp.full_like(max_ref, -jnp.inf)

    sum_ref[...] = sum_ref[...] + part_sum
    max_ref[...] = jnp.maximum(max_ref[...], part_max)

    @pl.when(s == pl.num_programs(1) - 1)
    def _finalize():
        avg = sum_ref[...] * inv_hw                    # (C, 1)  exact mean
        mx = max_ref[...]                              # (C, 1)
        w1t = w1t_ref[...].astype(jnp.float32)         # (C, hidden)
        w2 = w2_ref[...].astype(jnp.float32)           # (C, hidden)
        # fc1 (1x1 conv, C->hidden) as broadcast-mul + sublane reduce; ReLU per branch.
        h_avg = jnp.maximum(jnp.sum(w1t * avg, axis=0, keepdims=True), 0.0)  # (1, hidden)
        h_max = jnp.maximum(jnp.sum(w1t * mx, axis=0, keepdims=True), 0.0)   # (1, hidden)
        # fc2 (1x1 conv, hidden->C) is linear & bias-free: fc2(a)+fc2(m) == fc2(a+m).
        logits = jnp.sum(w2 * (h_avg + h_max), axis=1, keepdims=True)        # (C, 1)
        o_ref[0] = jax.nn.sigmoid(logits).astype(o_ref.dtype)


def _pick_spatial_chunk(hw, c, itemsize, budget_bytes=2 * 1024 * 1024):
    """Largest chunk of the H*W axis whose (C, chunk) block fits the VMEM budget,
    preferring lane-aligned (multiple-of-128) divisors of hw."""
    max_lanes = max(budget_bytes // (c * itemsize), 1)
    if hw <= max_lanes:
        return hw
    best, best_aligned = 1, None
    for d in range(1, max_lanes + 1):
        if hw % d == 0:
            best = d
            if d % 128 == 0:
                best_aligned = d
    return best_aligned if best_aligned is not None else best


def channel_attention(x, fc1_weight, fc2_weight, *, chunk=None):
    """x: (B,C,H,W); fc1_weight: (hidden,C,1,1); fc2_weight: (C,hidden,1,1) -> (B,C,1,1)."""
    B, C, H, W = x.shape
    HW = H * W
    hidden = fc1_weight.shape[0]
    assert fc1_weight.shape == (hidden, C, 1, 1)
    assert fc2_weight.shape == (C, hidden, 1, 1)

    if chunk is None:
        chunk = _pick_spatial_chunk(HW, C, x.dtype.itemsize)
    assert HW % chunk == 0, "spatial chunk must divide H*W"
    n_chunks = HW // chunk

    x3 = x.reshape(B, C, HW)                                      # no-copy NCHW reshape
    w1t = fc1_weight.reshape(hidden, C).T.astype(jnp.float32)     # (C, hidden)
    w2 = fc2_weight.reshape(C, hidden).astype(jnp.float32)        # (C, hidden)

    itemsize = x.dtype.itemsize
    cost = pl.CostEstimate(
        flops=2 * B * C * HW,                     # sum + max over the dominant tensor
        transcendentals=B * C,                    # sigmoid
        bytes_accessed=B * C * HW * itemsize + 2 * C * hidden * 4 + B * C * itemsize,
    )

    kern = functools.partial(_channel_attention_kernel, inv_hw=1.0 / HW)
    out = pl.pallas_call(
        kern,
        out_shape=jax.ShapeDtypeStruct((B, C, 1), x.dtype),
        grid_spec=pltpu.PrefetchScalarGridSpec(
            num_scalar_prefetch=0,
            grid=(B, n_chunks),                   # reduction (spatial) axis last
            in_specs=[
                pl.BlockSpec((1, C, chunk), lambda b, s: (b, 0, s)),
                pl.BlockSpec((C, hidden), lambda b, s: (0, 0)),
                pl.BlockSpec((C, hidden), lambda b, s: (0, 0)),
            ],
            out_specs=pl.BlockSpec((1, C, 1), lambda b, s: (b, 0, 0)),
            scratch_shapes=[
                pltpu.VMEM((C, 1), jnp.float32),  # running sum
                pltpu.VMEM((C, 1), jnp.float32),  # running max
            ],
        ),
        compiler_params=pltpu.CompilerParams(
            dimension_semantics=("parallel", "arbitrary")),
        cost_estimate=cost,
    )(x3, w1t, w2)
    return out.reshape(B, C, 1, 1)


def _reference(x, fc1_weight, fc2_weight):
    """Pure-JAX reference mirroring the PyTorch module exactly."""
    avg = jnp.mean(x, axis=(2, 3), keepdims=True)
    mx = jnp.max(x, axis=(2, 3), keepdims=True)

    def mlp(p):
        h = jax.lax.conv_general_dilated(
            p, fc1_weight, (1, 1), "VALID",
            dimension_numbers=("NCHW", "OIHW", "NCHW"))
        h = jax.nn.relu(h)
        return jax.lax.conv_general_dilated(
            h, fc2_weight, (1, 1), "VALID",
            dimension_numbers=("NCHW", "OIHW", "NCHW"))

    return jax.nn.sigmoid(mlp(avg) + mlp(mx))


if __name__ == "__main__":
    key = jax.random.PRNGKey(0)
    kx, k1, k2 = jax.random.split(key, 3)

    # The module hard-codes 16 channels (fc1: Conv2d(16,1,1), fc2: Conv2d(1,16,1)).
    B, C, H, W = 2, 16, 16, 16
    ratio = 16
    hidden = max(C // ratio, 1)                   # = 1

    x = jax.random.normal(kx, (B, C, H, W), dtype=jnp.float32)

    # PyTorch Conv2d default init: kaiming_uniform bound = 1/sqrt(fan_in), no bias.
    b1 = (1.0 / C) ** 0.5
    fc1_w = jax.random.uniform(k1, (hidden, C, 1, 1), jnp.float32, -b1, b1)
    b2 = (1.0 / hidden) ** 0.5
    fc2_w = jax.random.uniform(k2, (C, hidden, 1, 1), jnp.float32, -b2, b2)

    out = jax.block_until_ready(channel_attention(x, fc1_w, fc2_w))
    ref = jax.block_until_ready(_reference(x, fc1_w, fc2_w))
    assert out.shape == (B, C, 1, 1)
    assert jnp.allclose(out, ref, atol=1e-5, rtol=1e-5), "mismatch vs reference"

    # Also exercise the multi-chunk running sum/max accumulator path.
    out2 = jax.block_until_ready(channel_attention(x, fc1_w, fc2_w, chunk=128))
    assert jnp.allclose(out2, ref, atol=1e-5, rtol=1e-5), "mismatch vs reference (chunked)"

    print("KERNEL_OK")
</pallas_src>

<mosaic_0001>
module attributes {stable_mosaic.version = 11 : i64} {
  func.func @_channel_attention_kernel(%arg0: i32, %arg1: i32, %arg2: memref<1x16x256xf32, #tpu.memory_space<vmem>>, %arg3: memref<16x1xf32, #tpu.memory_space<vmem>>, %arg4: memref<16x1xf32, #tpu.memory_space<vmem>>, %arg5: memref<1x16x1xf32, #tpu.memory_space<vmem>>, %arg6: memref<16x1xf32, #tpu.memory_space<vmem>>, %arg7: memref<16x1xf32, #tpu.memory_space<vmem>>) attributes {dimension_semantics = [#tpu.dimension_semantics<parallel>, #tpu.dimension_semantics<arbitrary>], iteration_bounds = array<i64: 2, 1>, scalar_prefetch = 0 : i64, scratch_operands = 2 : i64, tpu.core_type = #tpu.core_type<tc>, window_params = [{transform_indices = @transform_0, window_bounds = array<i64: 1, 16, 256>}, {pipeline_mode = #tpu.pipeline_mode<synchronous>, transform_indices = @transform_1, window_bounds = array<i64: 16, 1>}, {pipeline_mode = #tpu.pipeline_mode<synchronous>, transform_indices = @transform_2, window_bounds = array<i64: 16, 1>}, {transform_indices = @transform_3, window_bounds = array<i64: 1, 16, 1>}]} {
    %c0 = arith.constant 0 : index
    %c0_0 = arith.constant 0 : index
    %c0_1 = arith.constant 0 : index
    %0 = vector.load %arg2[%c0, %c0_0, %c0_1] : memref<1x16x256xf32, #tpu.memory_space<vmem>>, vector<1x16x256xf32>
    %1 = vector.shape_cast %0 : vector<1x16x256xf32> to vector<16x256xf32>
    %cst = arith.constant dense<0.000000e+00> : vector<16xf32>
    %2 = vector.multi_reduction <add>, %1, %cst [1] : vector<16x256xf32> to vector<16xf32>
    %3 = vector.shape_cast %2 : vector<16xf32> to vector<16x1xf32>
    %cst_2 = arith.constant dense<0xFF800000> : vector<16xf32>
    %4 = vector.multi_reduction <maximumf>, %1, %cst_2 [1] : vector<16x256xf32> to vector<16xf32>
    %5 = vector.shape_cast %4 : vector<16xf32> to vector<16x1xf32>
    %c0_i32 = arith.constant 0 : i32
    %6 = arith.cmpi eq, %arg1, %c0_i32 : i32
    %7 = arith.extui %6 : i1 to i32
    %c0_i32_3 = arith.constant 0 : i32
    %8 = arith.cmpi ne, %7, %c0_i32_3 : i32
    scf.if %8 {
      %cst_14 = arith.constant 0.000000e+00 : f32
      %18 = vector.broadcast %cst_14 : f32 to vector<16x1xf32>
      %c0_15 = arith.constant 0 : index
      %c0_16 = arith.constant 0 : index
      %19 = vector.load %arg6[%c0_15, %c0_16] : memref<16x1xf32, #tpu.memory_space<vmem>>, vector<16x1xf32>
      tpu.vector_store %arg6[%c0_15, %c0_16], %18 {strides = array<i32>} : memref<16x1xf32, #tpu.memory_space<vmem>>, vector<16x1xf32>,
      %cst_17 = arith.constant 0xFF800000 : f32
      %20 = vector.broadcast %cst_17 : f32 to vector<16x1xf32>
      %c0_18 = arith.constant 0 : index
      %c0_19 = arith.constant 0 : index
      %21 = vector.load %arg7[%c0_18, %c0_19] : memref<16x1xf32, #tpu.memory_space<vmem>>, vector<16x1xf32>
      tpu.vector_store %arg7[%c0_18, %c0_19], %20 {strides = array<i32>} : memref<16x1xf32, #tpu.memory_space<vmem>>, vector<16x1xf32>,
    } else {
    }
    %c0_4 = arith.constant 0 : index
    %c0_5 = arith.constant 0 : index
    %9 = vector.load %arg6[%c0_4, %c0_5] : memref<16x1xf32, #tpu.memory_space<vmem>>, vector<16x1xf32>
    %10 = arith.addf %9, %3 : vector<16x1xf32>
    %c0_6 = arith.constant 0 : index
    %c0_7 = arith.constant 0 : index
    %11 = vector.load %arg6[%c0_6, %c0_7] : memref<16x1xf32, #tpu.memory_space<vmem>>, vector<16x1xf32>
    tpu.vector_store %arg6[%c0_6, %c0_7], %10 {strides = array<i32>} : memref<16x1xf32, #tpu.memory_space<vmem>>, vector<16x1xf32>,
    %c0_8 = arith.constant 0 : index
    %c0_9 = arith.constant 0 : index
    %12 = vector.load %arg7[%c0_8, %c0_9] : memref<16x1xf32, #tpu.memory_space<vmem>>, vector<16x1xf32>
    %13 = arith.maximumf %12, %5 : vector<16x1xf32>
    %c0_10 = arith.constant 0 : index
    %c0_11 = arith.constant 0 : index
    %14 = vector.load %arg7[%c0_10, %c0_11] : memref<16x1xf32, #tpu.memory_space<vmem>>, vector<16x1xf32>
    tpu.vector_store %arg7[%c0_10, %c0_11], %13 {strides = array<i32>} : memref<16x1xf32, #tpu.memory_space<vmem>>, vector<16x1xf32>,
    %c0_i32_12 = arith.constant 0 : i32
    %15 = arith.cmpi eq, %arg1, %c0_i32_12 : i32
    %16 = arith.extui %15 : i1 to i32
    %c0_i32_13 = arith.constant 0 : i32
    %17 = arith.cmpi ne, %16, %c0_i32_13 : i32
    scf.if %17 {
      %c0_14 = arith.constant 0 : index
      %c0_15 = arith.constant 0 : index
      %18 = vector.load %arg6[%c0_14, %c0_15] : memref<16x1xf32, #tpu.memory_space<vmem>>, vector<16x1xf32>
      %cst_16 = arith.constant 3.906250e-03 : f32
      %19 = vector.broadcast %cst_16 : f32 to vector<16x1xf32>
      %20 = arith.mulf %18, %19 : vector<16x1xf32>
      %c0_17 = arith.constant 0 : index
      %c0_18 = arith.constant 0 : index
      %21 = vector.load %arg7[%c0_17, %c0_18] : memref<16x1xf32, #tpu.memory_space<vmem>>, vector<16x1xf32>
      %c0_19 = arith.constant 0 : index
      %c0_20 = arith.constant 0 : index
      %22 = vector.load %arg3[%c0_19, %c0_20] : memref<16x1xf32, #tpu.memory_space<vmem>>, vector<16x1xf32>
      %c0_21 = arith.constant 0 : index
      %c0_22 = arith.constant 0 : index
      %23 = vector.load %arg4[%c0_21, %c0_22] : memref<16x1xf32, #tpu.memory_space<vmem>>, vector<16x1xf32>
      %24 = arith.mulf %22, %20 : vector<16x1xf32>
      %cst_23 = arith.constant dense<0.000000e+00> : vector<1xf32>
      %25 = vector.multi_reduction <add>, %24, %cst_23 [0] : vector<16x1xf32> to vector<1xf32>
      %26 = vector.shape_cast %25 : vector<1xf32> to vector<1x1xf32>
      %cst_24 = arith.constant 0.000000e+00 : f32
      %27 = vector.broadcast %cst_24 : f32 to vector<1x1xf32>
      %28 = arith.maximumf %26, %27 : vector<1x1xf32>
      %29 = arith.mulf %22, %21 : vector<16x1xf32>
      %cst_25 = arith.constant dense<0.000000e+00> : vector<1xf32>
      %30 = vector.multi_reduction <add>, %29, %cst_25 [0] : vector<16x1xf32> to vector<1xf32>
      %31 = vector.shape_cast %30 : vector<1xf32> to vector<1x1xf32>
      %cst_26 = arith.constant 0.000000e+00 : f32
      %32 = vector.broadcast %cst_26 : f32 to vector<1x1xf32>
      %33 = arith.maximumf %31, %32 : vector<1x1xf32>
      %34 = arith.addf %28, %33 : vector<1x1xf32>
      %35 = vector.broadcast %34 : vector<1x1xf32> to vector<16x1xf32>
      %36 = arith.mulf %23, %35 : vector<16x1xf32>
      %cst_27 = arith.constant dense<0.000000e+00> : vector<16xf32>
      %37 = vector.multi_reduction <add>, %36, %cst_27 [1] : vector<16x1xf32> to vector<16xf32>
      %38 = vector.shape_cast %37 : vector<16xf32> to vector<16x1xf32>
      %39 = arith.negf %38 : vector<16x1xf32>
      %40 = math.exp %39 : vector<16x1xf32>
      %cst_28 = arith.constant 1.000000e+00 : f32
      %41 = vector.broadcast %cst_28 : f32 to vector<16x1xf32>
      %42 = arith.addf %41, %40 : vector<16x1xf32>
      %43 = arith.divf %41, %42 : vector<16x1xf32>
      %c0_29 = arith.constant 0 : index
      %c0_30 = arith.constant 0 : index
      %c0_31 = arith.constant 0 : index
      %44 = vector.load %arg5[%c0_29, %c0_30, %c0_31] : memref<1x16x1xf32, #tpu.memory_space<vmem>>, vector<1x16x1xf32>
      %45 = vector.shape_cast %44 : vector<1x16x1xf32> to vector<16x1xf32>
      %46 = vector.shape_cast %43 : vector<16x1xf32> to vector<1x16x1xf32>
      tpu.vector_store %arg5[%c0_29, %c0_30, %c0_31], %46 {strides = array<i32>} : memref<1x16x1xf32, #tpu.memory_space<vmem>>, vector<1x16x1xf32>,
    } else {
    }
    return
  }
  func.func @transform_0(%arg0: i32, %arg1: i32) -> (i32, i32, i32) {
    %c0_i32 = arith.constant 0 : i32
    %c0_i32_0 = arith.constant 0 : i32
    return %arg0, %c0_i32, %arg1 : i32, i32, i32
  }
  func.func @transform_1(%arg0: i32, %arg1: i32) -> (i32, i32) {
    %c0_i32 = arith.constant 0 : i32
    %c0_i32_0 = arith.constant 0 : i32
    %c0_i32_1 = arith.constant 0 : i32
    return %c0_i32, %c0_i32_0 : i32, i32
  }
  func.func @transform_2(%arg0: i32, %arg1: i32) -> (i32, i32) {
    %c0_i32 = arith.constant 0 : i32
    %c0_i32_0 = arith.constant 0 : i32
    %c0_i32_1 = arith.constant 0 : i32
    return %c0_i32, %c0_i32_0 : i32, i32
  }
  func.func @transform_3(%arg0: i32, %arg1: i32) -> (i32, i32, i32) {
    %c0_i32 = arith.constant 0 : i32
    %c0_i32_0 = arith.constant 0 : i32
    %c0_i32_1 = arith.constant 0 : i32
    return %arg0, %c0_i32, %c0_i32_0 : i32, i32, i32
  }
}

</mosaic_0001>

<bundles_post_ra>
// kernel: tpu_custom_call.1
= control target key start
LH: loop header
LB: loop body
LE: loop exit
PB: predicated region body
PF: predicated region fallthrough
CT: control target
= control target key end

     0   :  { %8 = vsyncpa [#allocation5], 0  ;;  %s691_s0 = inlined_call_operand.hbm [shape: f32[2,16,256], index: 0, kind: input, shape index: {}]   ;;  %s692_s1 = inlined_call_operand.vmem [shape: f32[16,1], index: 1, kind: input, shape index: {}]   ;;  %s693_s2 = inlined_call_operand.vmem [shape: f32[16,1], index: 2, kind: input, shape index: {}]   ;;  %s694_s3 = inlined_call_operand.vmem [shape: f32[2,16,1], index: 3, kind: output, shape index: {}]  }
   0x1   :  { %10 = vsyncpa [#allocation5 + $0x1], 0  ;;  %s569_s12 = smov 0   ;;  %s571_s13 = smov 0  }
   0x2   :  { %s573_s14 = smov 0   ;;  %s575_s15 = smov 0  }
   0x3   :  { %s577_s16 = smov 0   ;;  %s579_s17 = smov 0  }
   0x4 LB: > { %s380_s18 = sadd.s32 4294967295, %s542_s17   ;;  %s28_s19 = sadd.s32 1, %s538_s16  ;;  %s542_s17 = sphi %s579_s17, %s16_s17   ;;  %s538_s16 = sphi %s577_s16, %s702_s16   ;;  %s534_s15 = sphi %s575_s15, %s701_s15   ;;  %s530_s14 = sphi %s573_s14, %s700_s14   ;;  %s526_s13 = sphi %s571_s13, %s699_s13   ;;  %s522_s12 = sphi %s569_s12, %s698_s12  }
   0x5   : > { %p30_p0 = scmp.ge.s32.totalorder %s28_s19, 2  ;;  %s37_s20 = sadd.s32 1, %s530_s14 }
   0x6   : > { %p44_p1 = scmp.ne.s32.totalorder %s530_s14, %s526_s13  ;;  %p45_p2 = scmp.eq.s32.totalorder %s542_s17, 0 }
   0x7   : > { %s704_s19 = smov (%p30_p0, %s28_s19), 0  ;;  %p50_p4 = scmp.ne.s32.totalorder %s526_s13, %s522_s12 }
   0x8   : > { %p605_p3 = por %p45_p2, %p44_p1  ;;  %s32_s22 = ssub.s32 %s538_s16, %s704_s19 }
   0x9   : > { %p51_p5 = scmp.eq.s32.totalorder %s380_s18, 0  ;;  %p35_p6 = scmp.eq.s32.totalorder %s32_s22, 0 }
   0xa   : > { %p403_p8 = scmp.lt.s32.totalorder %s542_s17, 2  ;;  %s148_s25 = sand.u32 1, %s530_s14  }
   0xb   : > { %p612_p7 = por %p51_p5, %p50_p4  ;;  %s395_s26 = sshll.u32 %s538_s16, 9 }
   0xc   : > { %s618_s24 = scalar_select %p35_p6, %s530_s14, %s37_s20  }
   0xd   : > { %s384_s27 = sshll.u32 %s148_s25, 5  ;;  %s160_s30 = scalar_lea.hbm %s691_s0, %s395_s26 }
   0xe   : > { %s152_s4 = scalar_lea.vmem [#allocation4], %s384_s27  ;;  %p627_p9 = pnand %p403_p8, %p605_p3 }
   0xf   : > { %s161_s5 = sshll.u32 %s152_s4, 4  ;;  %s149_s7 = scalar_lea.sflag [#allocation5], %s148_s25  ;;  %s162_s5 = int_to_ptr.vmem [resolvable:$true] %s161_s5 }
  0x10   : > { %p466_p10 = pneg %p627_p9  ;;  %s477_s8 = scalar_lea.vmem %s162_s5, 512 }
  0x11   : > { %p478_p11 = scmp.ne.s32.totalorder %s162_s5, %s477_s8  ;;  %s544_s9 = smov [#allocation4]  }
  0x12   : > { %s482_s10 = sshll.u32 %s544_s9, 4  ;;  %s483_s10 = int_to_ptr.vmem [resolvable:$false] %s482_s10 }
  0x13   : > { %p480_p12 = pnand %p478_p11, %p466_p10  ;;  %s484_s11 = scalar_lea.vmem %s483_s10, 1024 }
  0x14   : > { %p485_p0 = scmp.lt.s32.totalorder %s162_s5, %s483_s10  ;;  %p486_p1 = scmp.lt.s32.totalorder %s484_s11, %s477_s8 }
  0x15   : > { %p481_p13 = pneg %p480_p12 }
  0x16   : > { %p487_p2 = por %p486_p1, %p485_p0 }
  0x18   : > { %p488_p3 = pnand %p487_p2, %p481_p13 }
  0x1a   : > { %491 = shalt.err (!%p488_p3)
}
  0x1b   : > { %s545_s12 = smov 256   ;;  %s546_s18 = smov 16  }
  0x1c   : > { %402 = dma.hbm_to_vmem [thread:$0]  (!%p627_p9), %s160_s30, 512, %s162_s5, %s149_s7, %s545_s12, %s545_s12, %s546_s18  }
  0x1d   : > { %p387_p4 = scmp.ge.s32.totalorder %s542_s17, 1  ;;  %p169_p5 = scmp.lt.s32.totalorder %s542_s17, 3 }
  0x1f   : > { %p170_p6 = pnand %p387_p4, %p169_p5 }
  0x20   : > { %s175_s20 = sand.u32 (!%p170_p6), 1, %s526_s13  }
  0x21   : > { %173 = sbr.rel (%p170_p6) target bundleno = 253 (0xfd), region = 32  ;;  %s388_s21 = sshll.u32 (!%p170_p6), %s175_s20, 5 }
  0x22   : > { %s176_s22 = scalar_lea.sflag (!%p170_p6), [#allocation5], %s175_s20  ;;  %s179_s25 = scalar_lea.vmem (!%p170_p6), [#allocation4], %s388_s21 }
  0x26   : > { %517 = dma.done.wait (%p612_p7), %s176_s22, 512  }
  0x27   : > { %519 = vsyncadd (%p612_p7), %s176_s22, 4294966784  ;;  %vm228_vm0 = vcmask 7168   ;;  %v547_v0 = vmov -inf   ;;  %v208_v1 = vld [vmem:[%s179_s25] sm:$0xff]  ;;  %v209_v2 = vld [vmem:[%s179_s25 + $0x8] sm:$0xff]  ;;  %v548_v9 = vmov 0.0  }
  0x28   : > { %231 = vst.msk [vmem:[#allocation3] sm:$0xff] %vm228_vm0, %v547_v0  ;;  %232 = vst.msk [vmem:[#allocation3 + $0x8] sm:$0xff] %vm228_vm0, %v547_v0  ;;  %v210_v3 = vld [vmem:[%s179_s25 + $0x10] sm:$0xff]  ;;  %v218_v4 = vmax.f32 %v208_v1, %v209_v2  ;;  %v212_v5 = vadd.f32 %v209_v2, %v208_v1  ;;  %v211_v6 = vld [vmem:[%s179_s25 + $0x18] sm:$0xff]  ;;  %p203_p7 = scmp.lt.s32.totalorder %s534_s15, 1 }
  0x29   : > { %v221_v7 = vmax.f32 %v210_v3, %v211_v6  ;;  %v215_v8 = vadd.f32 %v211_v6, %v210_v3  ;;  %229 = vst.msk [vmem:[#allocation2] sm:$0xff] %vm228_vm0, %v548_v9  ;;  %230 = vst.msk [vmem:[#allocation2 + $0x8] sm:$0xff] %vm228_vm0, %v548_v9  ;;  %v255_v22 = vld [vmem:[%s692_s1] sm:$0xff]  ;;  %v256_v26 = vld [vmem:[%s692_s1 + $0x8] sm:$0xff] }
  0x2a   : > { %219 = vmax.xlane.f32.xlu1 %v218_v4  ;;  %213 = vadd.xlane.f32.xlu0 %v212_v5  ;;  %v257_v54 = vld [vmem:[%s693_s2] sm:$0xff]  ;;  %v258_v55 = vld [vmem:[%s693_s2 + $0x8] sm:$0xff]  ;;  %s706_s15 = smov (!%p203_p7, %s534_s15), 1 }
  0x2b   : > { %s396_s6 = sshll.u32 %s706_s15, 4 }
  0x2c   : > { %s207_s9 = scalar_lea.vmem %s694_s3, %s396_s6 }
  0x2e   : > { %222 = vmax.xlane.f32.xlu1 %v221_v7  ;;  %216 = vadd.xlane.f32.xlu0 %v215_v8 }
  0x2f   : > { %v240_v10 = vld [vmem:[#allocation3] sm:$0xff]  ;;  %v241_v16 = vld [vmem:[#allocation3 + $0x8] sm:$0xff] }
  0x30   : > { %v233_v11 = vld [vmem:[#allocation2] sm:$0xff]  ;;  %v234_v17 = vld [vmem:[#allocation2 + $0x8] sm:$0xff] }
  0xb3   : > { %v220_v12 = vpop.xlane.xlu1 %219  ;;  %v214_v13 = vpop.xlane.xlu0 %213 }
  0xb4   : > { %v242_v14 = vmax.f32 %v240_v10, %v220_v12  ;;  %v235_v15 = vadd.f32 %v233_v11, %v214_v13 }
  0xb6   : > { %244 = vst.msk [vmem:[#allocation3] sm:$0xff] %vm228_vm0, %v242_v14  ;;  %238 = vst.msk [vmem:[#allocation2] sm:$0xff] %vm228_vm0, %v235_v15 }
  0xb7   : > { %v223_v18 = vpop.xlane.xlu1 %222  ;;  %v217_v19 = vpop.xlane.xlu0 %216 }
  0xb8   : > { %v243_v20 = vmax.f32 %v241_v16, %v223_v18  ;;  %v236_v21 = vadd.f32 %v234_v17, %v217_v19 }
  0xba   : > { %245 = vst.msk [vmem:[#allocation3 + $0x8] sm:$0xff] %vm228_vm0, %v243_v20  ;;  %239 = vst.msk [vmem:[#allocation2 + $0x8] sm:$0xff] %vm228_vm0, %v236_v21 }
  0xbd   : > { %v253_v23 = vld [vmem:[#allocation3] sm:$0xff]  ;;  %v249_v24 = vld [vmem:[#allocation2] sm:$0xff] }
  0xbe   : > { %v251_v25 = vmul.f32 0.00390625, %v249_v24  ;;  %v271_v27 = vmul.f32 %v255_v22, %v253_v23 }
  0xc0   : > { %v259_v30 = vmul.f32 %v255_v22, %v251_v25  ;;  %v273_v33 = vsel %vm228_vm0, %v271_v27, 0.0 }
  0xc1   : > { %v254_v28 = vld [vmem:[#allocation3 + $0x8] sm:$0xff]  ;;  %v250_v29 = vld [vmem:[#allocation2 + $0x8] sm:$0xff] }
  0xc2   : > { %v272_v31 = vmul.f32 %v256_v26, %v254_v28  ;;  %v252_v32 = vmul.f32 0.00390625, %v250_v29  ;;  %v261_v37 = vsel %vm228_vm0, %v259_v30, 0.0 }
  0xc4   : > { %v274_v34 = vsel %vm228_vm0, %v272_v31, 0.0  ;;  %v260_v35 = vmul.f32 %v256_v26, %v252_v32 }
  0xc5   : > { %v275_v36 = vadd.f32 %v274_v34, %v273_v33 }
  0xc6   : > { %v262_v38 = vsel %vm228_vm0, %v260_v35, 0.0 }
  0xc7   : > { %v276_v39 = vrot.slane %v275_v36, 4  ;;  %v263_v40 = vadd.f32 %v262_v38, %v261_v37 }
  0xc9   : > { %v277_v41 = vadd.f32 %v276_v39, %v275_v36  ;;  %v264_v42 = vrot.slane %v263_v40, 4 }
  0xcb   : > { %v278_v43 = vrot.slane %v277_v41, 2  ;;  %v265_v44 = vadd.f32 %v264_v42, %v263_v40 }
  0xcd   : > { %v279_v45 = vadd.f32 %v278_v43, %v277_v41  ;;  %v266_v46 = vrot.slane %v265_v44, 2 }
  0xcf   : > { %v280_v47 = vrot.slane %v279_v45, 1  ;;  %v267_v48 = vadd.f32 %v266_v46, %v265_v44 }
  0xd1   : > { %v281_v49 = vadd.f32 %v280_v47, %v279_v45  ;;  %v268_v50 = vrot.slane %v267_v48, 1 }
  0xd3   : > { %v269_v51 = vadd.f32 %v268_v50, %v267_v48  ;;  %v282_v52 = vmax.f32 %v281_v49, 0.0 }
  0xd5   : > { %v270_v53 = vmax.f32 %v269_v51, 0.0 }
  0xd7   : > { %v283_v56 = vadd.f32 %v282_v52, %v270_v53 }
  0xd9   : > { %v284_v57 = vmul.f32 %v283_v56, %v257_v54  ;;  %v285_v58 = vmul.f32 %v283_v56, %v258_v55 }
  0xdb   : > { %v391_v59 = vmul.f32 -1.442695, %v284_v57  ;;  %v392_v60 = vmul.f32 -1.442695, %v285_v58 }
  0xdd   : > { %456 = vpow2.f32 %v391_v59 }
  0xde   : > { %458 = vpow2.f32 %v392_v60 }
  0xea   : > { %v457_v61 = vpop.eup %456 }
  0xeb   : > { %v459_v62 = vpop.eup %458  ;;  %v294_v63 = vadd.f32 1.0, %v457_v61 }
  0xec   : > { %v295_v0 = vadd.f32 1.0, %v459_v62 }
  0xed   : > { %460 = vrcp.f32 %v294_v63 }
  0xee   : > { %462 = vrcp.f32 %v295_v0 }
  0xfa   : > { %v461_v1 = vpop.eup %460 }
  0xfb   : > { %v463_v2 = vpop.eup %462  ;;  %300 = vst.msk [vmem:[%s207_s9] sm:$0xff] %vm228_vm0, %v461_v1 }
  0xfc   : > { %301 = vst.msk [vmem:[%s207_s9 + $0x8] sm:$0xff] %vm228_vm0, %v463_v2 }
  0xfd PF: > { %s16_s17 = sadd.s32 1, %s542_s17   ;;  %s698_s12 = smov %s526_s13 }
  0xfe   : > { %p13_p8 = scmp.ge.s32.totalorder %s16_s17, 4   ;;  %s699_s13 = smov %s530_s14 }
  0xff   : > { %s700_s14 = smov %s618_s24  ;;  %s701_s15 = smov %s538_s16 }
 0x100   : > { %s702_s16 = smov %s704_s19  ;;  %15 = sbr.rel (!%p13_p8) target bundleno = 4 (0x4), region = 80 }
 0x105   :  { %323 = vsyncpa [#allocation5], 1 }
 0x106   :  { %325 = vsyncpa [#allocation5 + $0x1], 1 }

</bundles_post_ra>
